<compile_context>
chip_gen: v7x
topology: tpu7x:2x2x1
jax: 0.10.0
libtpu: 0.0.40
codegen_flags: <defaults>
</compile_context>

<pallas_src>
import functools

import jax
import jax.numpy as jnp
from jax import lax
from jax.experimental import pallas as pl
from jax.experimental.pallas import tpu as pltpu


_LANE = 128                        # TPU lane width (last-dim tiling quantum)
_DEFAULT_BLOCK_BYTES = 4 << 20     # ~4 MiB per streamed feature block


# ---------------------------------------------------------------------------
# helpers
# ---------------------------------------------------------------------------
def _round_down(x, m):
    return max((x // m) * m, 0)


def _cdiv(a, b):
    return (a + b - 1) // b


def _vmem_capacity_bytes():
    """Physical VMEM per core; conservative fallback if the query fails."""
    try:
        cap = getattr(pltpu.get_tpu_info(), "vmem_capacity_bytes", None)
        if cap:
            return int(cap)
    except Exception:
        pass
    return 64 << 20  # v7x has the smallest physical VMEM (64 MiB) -> safe floor


def _choose_k_tile(m, k, itemsize, block_bytes):
    """Pick the streamed K-tile width and grid size.

    Double-buffered (m, tk) feature blocks + the resident f32 accumulator +
    the (double-buffered) f32 target gram are kept under ~3/4 of physical
    VMEM.  Within that cap, the tile targets `block_bytes` per block so the
    ~0.35us per-grid-step overhead and tiny DMAs do not dominate.  If all of
    K fits in one block, the whole (unpadded) K axis is a single tile -- no
    padding and no masking needed.
    """
    budget = (_vmem_capacity_bytes() * 3) // 4
    resident = 3 * 4 * m * m                       # acc + 2x target buffers
    avail = max(budget - resident, 2 * _LANE * m * itemsize)
    tk_cap = max(_LANE, _round_down(avail // (2 * m * itemsize), _LANE))
    tk_goal = max(_LANE, _round_down(block_bytes // (m * itemsize), _LANE))
    tk = min(tk_cap, tk_goal)
    if tk >= k:
        tk = k                 # single full-width tile (equals full array dim)
    return tk, _cdiv(k, tk)


def _vmem_limit_bytes(m, tk, itemsize):
    """Explicit scoped-VMEM limit (default 16/32 MiB is well below physical)."""
    need = 2 * m * tk * itemsize + 3 * 4 * m * m
    return int(min(_vmem_capacity_bytes(), max(2 * need, 32 << 20)))


def _masked_tile(f_ref, k_idx, nk, tk, k_total):
    """Load the current feature tile; zero garbage columns of a ragged tail.

    Only emitted (statically) when the final grid tile extends past K; the
    masked columns contribute exactly 0 to F @ F^T, so results are exact."""
    f = f_ref[...]
    rem = k_total % tk
    if rem:
        col = lax.broadcasted_iota(jnp.int32, f.shape, 1)
        lim = jnp.where(k_idx == nk - 1, rem, tk)
        f = jnp.where(col < lim, f, jnp.zeros_like(f))
    return f


# ---------------------------------------------------------------------------
# kernels
# ---------------------------------------------------------------------------
def _gram_kernel(f_ref, g_ref, *, scale, tk, k_total):
    """K-streamed accumulator: G = (F @ F^T) * scale.

    The output block index is constant across the K grid axis, so g_ref is
    VMEM-resident and doubles as the accumulator."""
    k_idx = pl.program_id(0)
    nk = pl.num_programs(0)

    @pl.when(k_idx == 0)
    def _():
        g_ref[...] = jnp.zeros_like(g_ref)

    f = _masked_tile(f_ref, k_idx, nk, tk, k_total)
    # Contract the last axis of both operands -> feeds the MXU directly,
    # no XLU transpose of f.
    g_ref[...] += lax.dot_general(
        f, f,
        dimension_numbers=(((1,), (1,)), ((), ())),
        preferred_element_type=jnp.float32)

    @pl.when(k_idx == nk - 1)
    def _():
        g_ref[...] *= scale


def _style_loss_kernel(f_ref, t_ref, loss_ref, acc_ref, *, scale, inv_n, tk,
                       k_total):
    """Fused: stream K tiles into a gram accumulator, then MSE vs target.

    Only a (1, 1) scalar loss is written out (SMEM); the gram lives purely in
    VMEM scratch, avoiding the M*M HBM writeback."""
    k_idx = pl.program_id(0)
    nk = pl.num_programs(0)

    @pl.when(k_idx == 0)
    def _():
        acc_ref[...] = jnp.zeros_like(acc_ref)

    f = _masked_tile(f_ref, k_idx, nk, tk, k_total)
    acc_ref[...] += lax.dot_general(
        f, f,
        dimension_numbers=(((1,), (1,)), ((), ())),
        preferred_element_type=jnp.float32)

    @pl.when(k_idx == nk - 1)
    def _():
        diff = acc_ref[...] * scale - t_ref[...]
        loss_ref[0, 0] = jnp.sum(diff * diff) * inv_n


# ---------------------------------------------------------------------------
# wrappers
# ---------------------------------------------------------------------------
def gram_matrix(x, *, block_bytes=_DEFAULT_BLOCK_BYTES):
    """Pallas equivalent of the PyTorch gram_matrix() helper."""
    a, b, c, d = x.shape
    m, k = a * b, c * d
    feats = x.reshape(m, k)                       # view-style reshape, no pad
    itemsize = jnp.dtype(feats.dtype).itemsize
    scale = 1.0 / float(a * b * c * d)
    tk, grid = _choose_k_tile(m, k, itemsize, block_bytes)

    return pl.pallas_call(
        functools.partial(_gram_kernel, scale=scale, tk=tk, k_total=k),
        grid=(grid,),
        out_shape=jax.ShapeDtypeStruct((m, m), jnp.float32),
        in_specs=[pl.BlockSpec((m, tk), lambda kk: (0, kk))],
        out_specs=pl.BlockSpec((m, m), lambda kk: (0, 0)),
        compiler_params=pltpu.CompilerParams(
            dimension_semantics=("arbitrary",),
            vmem_limit_bytes=_vmem_limit_bytes(m, tk, itemsize)),
        cost_estimate=pl.CostEstimate(
            flops=2 * m * m * k,
            bytes_accessed=m * k * itemsize + m * m * 4,
            transcendentals=0),
    )(feats)


class StyleLoss:
    """Mirrors the PyTorch StyleLoss module: stores the target gram at init,
    forward computes self.loss and returns the input unchanged."""

    def __init__(self, target_feature, *, block_bytes=_DEFAULT_BLOCK_BYTES):
        self.block_bytes = int(block_bytes)
        self.target = gram_matrix(target_feature, block_bytes=self.block_bytes)
        self.loss = None

    def __call__(self, x):
        a, b, c, d = x.shape
        m, k = a * b, c * d
        if self.target.shape != (m, m):
            raise ValueError(
                f"StyleLoss: input gram shape {(m, m)} does not match the "
                f"stored target gram shape {self.target.shape}")

        feats = x.reshape(m, k)                   # no wrapper-side padding
        itemsize = jnp.dtype(feats.dtype).itemsize
        scale = 1.0 / float(a * b * c * d)
        tk, grid = _choose_k_tile(m, k, itemsize, self.block_bytes)
        target = self.target.astype(jnp.float32)

        loss = pl.pallas_call(
            functools.partial(
                _style_loss_kernel, scale=scale, inv_n=1.0 / float(m * m),
                tk=tk, k_total=k),
            grid=(grid,),
            out_shape=jax.ShapeDtypeStruct((1, 1), jnp.float32),
            in_specs=[
                # Streamed K tiles of the features (double-buffered by Pallas).
                pl.BlockSpec((m, tk), lambda kk: (0, kk)),
                # Target gram: constant block index -> fetched once, resident.
                pl.BlockSpec((m, m), lambda kk: (0, 0)),
            ],
            out_specs=pl.BlockSpec(memory_space=pltpu.SMEM),
            scratch_shapes=[pltpu.VMEM((m, m), jnp.float32)],
            compiler_params=pltpu.CompilerParams(
                dimension_semantics=("arbitrary",),
                vmem_limit_bytes=_vmem_limit_bytes(m, tk, itemsize)),
            cost_estimate=pl.CostEstimate(
                flops=2 * m * m * k,
                bytes_accessed=m * k * itemsize + m * m * 4 + 4,
                transcendentals=0),
        )(feats, target)

        self.loss = loss[0, 0]
        return x  # forward returns its input unchanged (pass-through layer)


# ---------------------------------------------------------------------------
# demo / self-check
# ---------------------------------------------------------------------------
if __name__ == "__main__":
    def _gram_ref(z):
        a, b, c, d = z.shape
        f = z.reshape(a * b, c * d).astype(jnp.float32)
        return (f @ f.T) / (a * b * c * d)

    key = jax.random.PRNGKey(0)
    k1, k2, k3, k4, k5, k6 = jax.random.split(key, 6)

    # Case 1: NCHW batch=2, channels=4, spatial=16x16 -> features (8, 256),
    # single full-width K tile.
    tf1 = jax.random.normal(k1, (2, 4, 16, 16), dtype=jnp.float32)
    x1 = jax.random.normal(k2, (2, 4, 16, 16), dtype=jnp.float32)
    mod1 = StyleLoss(tf1)
    out1 = mod1(x1)
    jax.block_until_ready((out1, mod1.loss))
    ref1 = jnp.mean((_gram_ref(x1) - _gram_ref(tf1)) ** 2)
    assert jnp.allclose(out1, x1)
    assert jnp.allclose(mod1.loss, ref1, rtol=1e-5, atol=1e-6), (mod1.loss, ref1)

    # Case 2: K = 576 (not lane-aligned) still handled as one full-width tile
    # -- no padding, no masking, no extra HBM pass.
    tf2 = jax.random.normal(k3, (2, 4, 24, 24), dtype=jnp.float32)
    x2 = jax.random.normal(k4, (2, 4, 24, 24), dtype=jnp.float32)
    mod2 = StyleLoss(tf2)
    out2 = mod2(x2)
    jax.block_until_ready((out2, mod2.loss))
    ref2 = jnp.mean((_gram_ref(x2) - _gram_ref(tf2)) ** 2)
    assert jnp.allclose(out2, x2)
    assert jnp.allclose(mod2.loss, ref2, rtol=1e-5, atol=1e-6), (mod2.loss, ref2)

    # Case 3: force the streamed multi-step K path with a ragged final tile
    # (block_bytes=8 KiB -> tk=256, K=576 -> grid of 3, 64 valid tail columns).
    tf3 = jax.random.normal(k5, (2, 4, 24, 24), dtype=jnp.float32)
    x3 = jax.random.normal(k6, (2, 4, 24, 24), dtype=jnp.float32)
    mod3 = StyleLoss(tf3, block_bytes=8 * 1024)
    out3 = mod3(x3)
    jax.block_until_ready((out3, mod3.loss))
    ref3 = jnp.mean((_gram_ref(x3) - _gram_ref(tf3)) ** 2)
    assert jnp.allclose(out3, x3)
    assert jnp.allclose(mod3.loss, ref3, rtol=1e-5, atol=1e-6), (mod3.loss, ref3)

    print("KERNEL_OK")
</pallas_src>

<mosaic_0001>
module attributes {stable_mosaic.version = 11 : i64} {
  func.func @_gram_kernel(%arg0: i32, %arg1: memref<8x256xf32, #tpu.memory_space<vmem>>, %arg2: memref<8x8xf32, #tpu.memory_space<vmem>>) attributes {dimension_semantics = [#tpu.dimension_semantics<arbitrary>], iteration_bounds = array<i64: 1>, scalar_prefetch = 0 : i64, scratch_operands = 0 : i64, tpu.core_type = #tpu.core_type<tc>, window_params = [{transform_indices = @transform_0, window_bounds = array<i64: 8, 256>}, {pipeline_mode = #tpu.pipeline_mode<synchronous>, transform_indices = @transform_1, window_bounds = array<i64: 8, 8>}]} {
    %c0_i32 = arith.constant 0 : i32
    %0 = arith.cmpi eq, %arg0, %c0_i32 : i32
    %1 = arith.extui %0 : i1 to i32
    %c0_i32_0 = arith.constant 0 : i32
    %2 = arith.cmpi ne, %1, %c0_i32_0 : i32
    scf.if %2 {
      %cst_8 = arith.constant 0.000000e+00 : f32
      %11 = vector.broadcast %cst_8 : f32 to vector<8x8xf32>
      %c0_9 = arith.constant 0 : index
      %c0_10 = arith.constant 0 : index
      %12 = vector.load %arg2[%c0_9, %c0_10] : memref<8x8xf32, #tpu.memory_space<vmem>>, vector<8x8xf32>
      tpu.vector_store %arg2[%c0_9, %c0_10], %11 {strides = array<i32>} : memref<8x8xf32, #tpu.memory_space<vmem>>, vector<8x8xf32>,
    } else {
    }
    %c0 = arith.constant 0 : index
    %c0_1 = arith.constant 0 : index
    %3 = vector.load %arg1[%c0, %c0_1] : memref<8x256xf32, #tpu.memory_space<vmem>>, vector<8x256xf32>
    %c0_2 = arith.constant 0 : index
    %c0_3 = arith.constant 0 : index
    %4 = vector.load %arg2[%c0_2, %c0_3] : memref<8x8xf32, #tpu.memory_space<vmem>>, vector<8x8xf32>
    %cst = arith.constant dense<0.000000e+00> : vector<8x8xf32>
    %5 = tpu.matmul %3, %3, %cst {dimension_numbers = #tpu.dot_dimension_numbers<[1], [1], [0], [0], [0, 0, 1, 0], [], []>} : vector<8x256xf32>, vector<8x256xf32>, vector<8x8xf32> -> vector<8x8xf32>
    %6 = arith.addf %4, %5 : vector<8x8xf32>
    %c0_4 = arith.constant 0 : index
    %c0_5 = arith.constant 0 : index
    %7 = vector.load %arg2[%c0_4, %c0_5] : memref<8x8xf32, #tpu.memory_space<vmem>>, vector<8x8xf32>
    tpu.vector_store %arg2[%c0_4, %c0_5], %6 {strides = array<i32>} : memref<8x8xf32, #tpu.memory_space<vmem>>, vector<8x8xf32>,
    %c0_i32_6 = arith.constant 0 : i32
    %8 = arith.cmpi eq, %arg0, %c0_i32_6 : i32
    %9 = arith.extui %8 : i1 to i32
    %c0_i32_7 = arith.constant 0 : i32
    %10 = arith.cmpi ne, %9, %c0_i32_7 : i32
    scf.if %10 {
      %c0_8 = arith.constant 0 : index
      %c0_9 = arith.constant 0 : index
      %11 = vector.load %arg2[%c0_8, %c0_9] : memref<8x8xf32, #tpu.memory_space<vmem>>, vector<8x8xf32>
      %cst_10 = arith.constant 4.8828125E-4 : f32
      %12 = vector.broadcast %cst_10 : f32 to vector<8x8xf32>
      %13 = arith.mulf %11, %12 : vector<8x8xf32>
      %c0_11 = arith.constant 0 : index
      %c0_12 = arith.constant 0 : index
      %14 = vector.load %arg2[%c0_11, %c0_12] : memref<8x8xf32, #tpu.memory_space<vmem>>, vector<8x8xf32>
      tpu.vector_store %arg2[%c0_11, %c0_12], %13 {strides = array<i32>} : memref<8x8xf32, #tpu.memory_space<vmem>>, vector<8x8xf32>,
    } else {
    }
    return
  }
  func.func @transform_0(%arg0: i32) -> (i32, i32) {
    %c0_i32 = arith.constant 0 : i32
    %c0_i32_0 = arith.constant 0 : i32
    return %c0_i32, %arg0 : i32, i32
  }
  func.func @transform_1(%arg0: i32) -> (i32, i32) {
    %c0_i32 = arith.constant 0 : i32
    %c0_i32_0 = arith.constant 0 : i32
    %c0_i32_1 = arith.constant 0 : i32
    return %c0_i32, %c0_i32_0 : i32, i32
  }
}

</mosaic_0001>

<bundles_post_ra>
// kernel: tpu_custom_call.1
= control target key start
LH: loop header
LB: loop body
LE: loop exit
PB: predicated region body
PF: predicated region fallthrough
CT: control target
= control target key end

     0   :  { %6 = vsyncpa [#allocation3], 0  ;;  %s215_s0 = inlined_call_operand.hbm [shape: f32[8,256], index: 0, kind: input, shape index: {}]   ;;  %s216_s1 = inlined_call_operand.hbm [shape: f32[8,8], index: 1, kind: output, shape index: {}]  }
   0x1   :  { %7 = vsyncpa [#allocation4], 0  ;;  %s175_s6 = smov [#allocation2]   ;;  %s127_s10 = scalar_lea.hbm %s215_s0, 256 }
   0x2   :  { %s14_s7 = sshll.u32 %s175_s6, 4  ;;  %p128_p0 = scmp.ne.s32.totalorder %s215_s0, %s127_s10  ;;  %s15_s7 = int_to_ptr.vmem [resolvable:$true] %s14_s7 }
   0x3   :  { %p131_p1 = scmp.lt.u32.totalorder %s127_s10, %s215_s0 }
   0x5   :  { %p133_p2 = pnand %p131_p1, %p128_p0 }
   0x7   :  { %136 = shalt.err (!%p133_p2)
}
   0x8   :  { %s137_s15 = scalar_lea.vmem %s15_s7, 256  ;;  %p142_p4 = scmp.lt.s32.totalorder %s15_s7, %s15_s7 }
   0x9   :  { %p138_p3 = scmp.ne.s32.totalorder %s15_s7, %s137_s15  ;;  %p143_p5 = scmp.lt.s32.totalorder %s137_s15, %s137_s15 }
   0xb   :  { %p144_p6 = por %p143_p5, %p142_p4 }
   0xd   :  { %p145_p7 = pnand %p144_p6, %p138_p3 }
   0xf   :  { %148 = shalt.err (!%p145_p7)
}
  0x10   :  { %17 = dma.hbm_to_vmem [thread:$0]  %s215_s0, 256, %s15_s7, [#allocation3]  }
  0x11   :  { %171 = dma.done.wait [#allocation3], 256  }
  0x12   :  { %172 = vsyncadd [#allocation3], 4294967040  ;;  %vm25_vm0 = vcmask 64512   ;;  %v176_v0 = vmov 0.0   ;;  %v28_v1 = vld [vmem:[#allocation2 + $0x8] sm:$0xff]  ;;  %v27_v2 = vld [vmem:[#allocation2] sm:$0xff] }
  0x13   :  { %26 = vst.msk [vmem:[#allocation5] sm:$0xff] %vm25_vm0, %v176_v0  ;;  %30 = vmatprep.subr.mxu0 %v28_v1  ;;  %94 = vmatprep.mubr.f32.mxu0 %v28_v1  ;;  %s177_s18 = smov [#allocation5]  }
  0x14   :  { %31 = vmatpush1.xpose.msra.mxu0 %v27_v2  ;;  %s115_s0 = sshll.u32 %s177_s18, 4  ;;  %s116_s0 = int_to_ptr.vmem [resolvable:$true] %s115_s0 }
  0x15   :  { %s149_s19 = scalar_lea.vmem %s116_s0, 128  ;;  %p154_p9 = scmp.lt.s32.totalorder %s116_s0, %s116_s0 }
  0x16   :  { %p150_p8 = scmp.ne.s32.totalorder %s116_s0, %s149_s19  ;;  %p155_p10 = scmp.lt.s32.totalorder %s149_s19, %s149_s19 }
  0x17   :  { %95 = vmatmul.mubr.f32.vlgmr.msra.gmra.mrb[0].mxu0 %v27_v2 }
  0x18   :  { %p156_p11 = por %p155_p10, %p154_p9 }
  0x1a   :  { %v29_v3 = vld [vmem:[#allocation5] sm:$0xff]  ;;  %p157_p12 = pnand %p156_p11, %p150_p8 }
  0xea   :  { %v96_v4 = vpop.f32.mrb[0].mxu0 }
  0xeb   :  { %v100_v5 = vadd.f32 %v96_v4, %v29_v3  ;;  %v98_v6 = vpop.f32.mrb[1].mxu0 }
  0xed   :  { %102 = vst.msk [vmem:[#allocation5] sm:$0xff] %vm25_vm0, %v100_v5 }
  0xf4   :  { %v106_v7 = vld [vmem:[#allocation5] sm:$0xff] }
  0xf5   :  { %v107_v8 = vmul.f32 0.00048828125, %v106_v7 }
  0xf7   :  { %108 = vst.msk [vmem:[#allocation5] sm:$0xff] %vm25_vm0, %v107_v8 }
  0xf8   :  { %160 = shalt.err (!%p157_p12)
}
  0xf9   :  { %s161_s22 = scalar_lea.hbm %s216_s1, 128 }
  0xfa   :  { %p162_p13 = scmp.ne.s32.totalorder %s216_s1, %s161_s22  ;;  %p165_p0 = scmp.lt.u32.totalorder %s161_s22, %s216_s1 }
  0xfc   :  { %p167_p1 = pnand %p165_p0, %p162_p13 }
  0xfe   :  { %170 = shalt.err (!%p167_p1)
}
  0xff   :  { %118 = dma.vmem_to_hbm [thread:$0]  %s116_s0, 128, %s216_s1, [#allocation4]  }
 0x100   :  { %173 = dma.done.wait [#allocation4], 128  }
 0x101   :  { %174 = vsyncadd [#allocation4], 4294967168 }
 0x102   :  { %122 = vsyncpa [#allocation3], 1 }
 0x103   :  { %123 = vsyncpa [#allocation4], 1 }

</bundles_post_ra>
